<compile_context>
chip_gen: v5e
topology: v5e:2x2
jax: 0.10.0
libtpu: 0.0.40
codegen_flags: <defaults>
</compile_context>

<pallas_src>
import functools
import math

import jax
import jax.numpy as jnp
from jax import lax
from jax.experimental import pallas as pl
from jax.experimental.pallas import tpu as pltpu


def _align_down(n, m):
    return max(m, (n // m) * m)


def _choose_tile(full, pref, align):
    # The full dim is always a legal block size; otherwise align to `align`.
    if full <= pref:
        return full
    return _align_down(pref, align)


def _vmem_need(tm, tn, d, x_item, w_item, out_item):
    return (2 * tm * d * x_item          # double-buffered x tile (bf16)
            + 2 * d * tn * w_item        # double-buffered weight tile (bf16)
            + 2 * 8 * tn * 4             # bias tile (padded to 8 sublanes)
            + 2 * tm * tn * out_item     # double-buffered output tile
            + 3 * tm * tn * 4            # f32 logits / exp intermediates
            + 2 * tm * 128 * 4)          # running max / sum scratch (lane pad)


def _projection_kernel(x_ref, w_ref, b_ref, o_ref, m_sc, l_sc, *, tn, vocab):
    p = pl.program_id(1)          # 0: online-logsumexp sweep, 1: write sweep
    j = pl.program_id(2)          # vocab tile index

    # MXU matmul: bf16 operands, f32 accumulate.  Bias is already f32.
    logits = jnp.dot(x_ref[...], w_ref[...], preferred_element_type=jnp.float32)
    logits = logits + b_ref[...]

    if vocab % tn != 0:
        # Partial last vocab tile: padded lanes must not pollute max / sum.
        col = j * tn + lax.broadcasted_iota(jnp.int32, logits.shape, 1)
        logits = jnp.where(col < vocab, logits, -jnp.inf)

    @pl.when(p == 0)
    def _():
        @pl.when(j == 0)
        def _():
            m_sc[...] = jnp.full_like(m_sc, -jnp.inf)
            l_sc[...] = jnp.zeros_like(l_sc)
        m_prev = m_sc[...]
        m_new = jnp.maximum(m_prev, jnp.max(logits, axis=-1, keepdims=True))
        l_sc[...] = (l_sc[...] * jnp.exp(m_prev - m_new)
                     + jnp.sum(jnp.exp(logits - m_new), axis=-1, keepdims=True))
        m_sc[...] = m_new

    @pl.when(p == 1)
    def _():
        lse = m_sc[...] + jnp.log(l_sc[...])
        o_ref[...] = (logits - lse).astype(o_ref.dtype)


def projection_layer(x, w, b, *, tm=256, tn=1024,
                     matmul_dtype=jnp.bfloat16, out_dtype=jnp.float32):
    """log_softmax(x @ w.T + b, axis=-1).  x: (B,S,D), w: (V,D), b: (V,)."""
    B, S, D = x.shape
    V = w.shape[0]
    assert w.shape == (V, D) and b.shape == (V,)

    M = B * S
    x2 = x.reshape(M, D).astype(matmul_dtype)       # halve x HBM / VMEM bytes
    wt = w.T.astype(matmul_dtype)                   # (D, V), pre-cast once
    b2 = b.reshape(1, V).astype(jnp.float32)

    tm_eff = _choose_tile(M, tm, 8)
    tn_eff = _choose_tile(V, tn, 128)

    x_item = jnp.dtype(matmul_dtype).itemsize
    out_item = jnp.dtype(out_dtype).itemsize
    try:
        vmem_cap = pltpu.get_tpu_info().vmem_capacity_bytes
    except Exception:
        vmem_cap = 64 * 2**20                       # conservative (v7x per-TC)
    budget = int(0.7 * vmem_cap)                    # leave headroom

    # Auto-shrink tiles so the full footprint (incl. f32 temporaries) fits.
    while _vmem_need(tm_eff, tn_eff, D, x_item, x_item, out_item) > budget:
        if tn_eff > 512:
            tn_eff = _align_down(tn_eff // 2, 128)
        elif tm_eff > 64:
            tm_eff = _align_down(tm_eff // 2, 8)
        elif tn_eff > 128:
            tn_eff = _align_down(tn_eff // 2, 128)
        elif tm_eff > 8:
            tm_eff = _align_down(tm_eff // 2, 8)
        else:
            break

    gi = pl.cdiv(M, tm_eff)
    gj = pl.cdiv(V, tn_eff)
    grid = (gi, 2, gj)     # rows (parallel), pass (lse / write), vocab tiles

    need = _vmem_need(tm_eff, tn_eff, D, x_item, x_item, out_item)
    vmem_limit = int(min(budget, max(int(1.3 * need), 16 * 2**20)))

    cost = pl.CostEstimate(
        flops=2 * 2 * M * D * V,                    # logits computed twice
        transcendentals=M * V + M * (gj + 1),
        bytes_accessed=(x2.size * x_item + 2 * wt.size * x_item + V * 4
                        + M * V * out_item),
    )

    out = pl.pallas_call(
        functools.partial(_projection_kernel, tn=tn_eff, vocab=V),
        out_shape=jax.ShapeDtypeStruct((M, V), out_dtype),
        grid_spec=pltpu.PrefetchScalarGridSpec(
            num_scalar_prefetch=0,
            grid=grid,
            in_specs=[
                pl.BlockSpec((tm_eff, D), lambda i, p, j: (i, 0)),    # x rows
                pl.BlockSpec((D, tn_eff), lambda i, p, j: (0, j)),    # weight
                pl.BlockSpec((1, tn_eff), lambda i, p, j: (0, j)),    # bias
            ],
            # During pass 0 the output stays parked on block (i, 0) and is
            # never written, so nothing bogus is ever written back to HBM.
            out_specs=pl.BlockSpec((tm_eff, tn_eff),
                                   lambda i, p, j: (i, p * j)),
            scratch_shapes=[
                pltpu.VMEM((tm_eff, 1), jnp.float32),   # running max
                pltpu.VMEM((tm_eff, 1), jnp.float32),   # running sum
            ],
        ),
        compiler_params=pltpu.CompilerParams(
            dimension_semantics=("parallel", "arbitrary", "arbitrary"),
            vmem_limit_bytes=vmem_limit,
        ),
        cost_estimate=cost,
    )(x2, wt, b2)

    return out.reshape(B, S, V)


def _reference(x, w, b):
    logits = x.astype(jnp.float32) @ w.T.astype(jnp.float32) + b.astype(jnp.float32)
    return jax.nn.log_softmax(logits, axis=-1)


if __name__ == "__main__":
    B, S, D, V = 2, 8, 32, 128          # batch, seq, d_model, vocab_size
    key = jax.random.PRNGKey(0)
    kx, kw, kb = jax.random.split(key, 3)

    x = jax.random.normal(kx, (B, S, D), dtype=jnp.float32)
    # nn.Linear-style parameters: weight (V, D), bias (V,)
    w = jax.random.normal(kw, (V, D), dtype=jnp.float32) * (1.0 / math.sqrt(D))
    b = jax.random.normal(kb, (V,), dtype=jnp.float32) * 0.02

    out = jax.block_until_ready(projection_layer(x, w, b))

    ref = _reference(x, w, b)
    assert out.shape == (B, S, V)
    err = float(jnp.max(jnp.abs(out - ref)))
    # bf16 matmul operands (f32 accumulate) -> slightly loosened tolerance.
    assert jnp.allclose(out, ref, atol=5e-2, rtol=1e-2), err
    # log_softmax rows must be (log-)normalized: logsumexp == 0.
    assert jnp.allclose(jax.scipy.special.logsumexp(out, axis=-1), 0.0, atol=1e-3)

    print("KERNEL_OK")
</pallas_src>

<mosaic_0001>
module attributes {stable_mosaic.version = 11 : i64} {
  func.func @_projection_kernel(%arg0: i32, %arg1: i32, %arg2: i32, %arg3: memref<16x32xbf16, #tpu.memory_space<vmem>>, %arg4: memref<32x128xbf16, #tpu.memory_space<vmem>>, %arg5: memref<1x128xf32, #tpu.memory_space<vmem>>, %arg6: memref<16x128xf32, #tpu.memory_space<vmem>>, %arg7: memref<16x1xf32, #tpu.memory_space<vmem>>, %arg8: memref<16x1xf32, #tpu.memory_space<vmem>>) attributes {dimension_semantics = [#tpu.dimension_semantics<parallel>, #tpu.dimension_semantics<arbitrary>, #tpu.dimension_semantics<arbitrary>], iteration_bounds = array<i64: 1, 2, 1>, scalar_prefetch = 0 : i64, scratch_operands = 2 : i64, tpu.core_type = #tpu.core_type<tc>, window_params = [{transform_indices = @transform_0, window_bounds = array<i64: 16, 32>}, {transform_indices = @transform_1, window_bounds = array<i64: 32, 128>}, {transform_indices = @transform_2, window_bounds = array<i64: 1, 128>}, {transform_indices = @transform_3, window_bounds = array<i64: 16, 128>}]} {
    %c0 = arith.constant 0 : index
    %c0_0 = arith.constant 0 : index
    %0 = vector.load %arg3[%c0, %c0_0] : memref<16x32xbf16, #tpu.memory_space<vmem>>, vector<16x32xbf16>
    %c0_1 = arith.constant 0 : index
    %c0_2 = arith.constant 0 : index
    %1 = vector.load %arg4[%c0_1, %c0_2] : memref<32x128xbf16, #tpu.memory_space<vmem>>, vector<32x128xbf16>
    %cst = arith.constant dense<0.000000e+00> : vector<16x128xf32>
    %2 = tpu.matmul %0, %1, %cst {dimension_numbers = #tpu.dot_dimension_numbers<[1], [0], [0], [1], [0, 0, 1, 1], [], []>} : vector<16x32xbf16>, vector<32x128xbf16>, vector<16x128xf32> -> vector<16x128xf32>
    %c0_3 = arith.constant 0 : index
    %c0_4 = arith.constant 0 : index
    %3 = vector.load %arg5[%c0_3, %c0_4] : memref<1x128xf32, #tpu.memory_space<vmem>>, vector<1x128xf32>
    %4 = vector.broadcast %3 : vector<1x128xf32> to vector<16x128xf32>
    %5 = arith.addf %2, %4 : vector<16x128xf32>
    %c0_i32 = arith.constant 0 : i32
    %6 = arith.cmpi eq, %arg1, %c0_i32 : i32
    %7 = arith.extui %6 : i1 to i32
    %c0_i32_5 = arith.constant 0 : i32
    %8 = arith.cmpi ne, %7, %c0_i32_5 : i32
    scf.if %8 {
      %c0_i32_7 = arith.constant 0 : i32
      %12 = arith.cmpi eq, %arg2, %c0_i32_7 : i32
      %13 = arith.extui %12 : i1 to i32
      %c0_i32_8 = arith.constant 0 : i32
      %14 = arith.cmpi ne, %13, %c0_i32_8 : i32
      scf.if %14 {
        %cst_19 = arith.constant 0xFF800000 : f32
        %31 = vector.broadcast %cst_19 : f32 to vector<16x1xf32>
        %c0_20 = arith.constant 0 : index
        %c0_21 = arith.constant 0 : index
        %32 = vector.load %arg7[%c0_20, %c0_21] : memref<16x1xf32, #tpu.memory_space<vmem>>, vector<16x1xf32>
        tpu.vector_store %arg7[%c0_20, %c0_21], %31 {strides = array<i32>} : memref<16x1xf32, #tpu.memory_space<vmem>>, vector<16x1xf32>,
        %cst_22 = arith.constant 0.000000e+00 : f32
        %33 = vector.broadcast %cst_22 : f32 to vector<16x1xf32>
        %c0_23 = arith.constant 0 : index
        %c0_24 = arith.constant 0 : index
        %34 = vector.load %arg8[%c0_23, %c0_24] : memref<16x1xf32, #tpu.memory_space<vmem>>, vector<16x1xf32>
        tpu.vector_store %arg8[%c0_23, %c0_24], %33 {strides = array<i32>} : memref<16x1xf32, #tpu.memory_space<vmem>>, vector<16x1xf32>,
      } else {
      }
      %c0_9 = arith.constant 0 : index
      %c0_10 = arith.constant 0 : index
      %15 = vector.load %arg7[%c0_9, %c0_10] : memref<16x1xf32, #tpu.memory_space<vmem>>, vector<16x1xf32>
      %cst_11 = arith.constant dense<0xFF800000> : vector<16xf32>
      %16 = vector.multi_reduction <maximumf>, %5, %cst_11 [1] : vector<16x128xf32> to vector<16xf32>
      %17 = vector.shape_cast %16 : vector<16xf32> to vector<16x1xf32>
      %18 = arith.maximumf %15, %17 : vector<16x1xf32>
      %c0_12 = arith.constant 0 : index
      %c0_13 = arith.constant 0 : index
      %19 = vector.load %arg8[%c0_12, %c0_13] : memref<16x1xf32, #tpu.memory_space<vmem>>, vector<16x1xf32>
      %20 = arith.subf %15, %18 : vector<16x1xf32>
      %21 = math.exp %20 : vector<16x1xf32>
      %22 = arith.mulf %19, %21 : vector<16x1xf32>
      %23 = vector.broadcast %18 : vector<16x1xf32> to vector<16x128xf32>
      %24 = arith.subf %5, %23 : vector<16x128xf32>
      %25 = math.exp %24 : vector<16x128xf32>
      %cst_14 = arith.constant dense<0.000000e+00> : vector<16xf32>
      %26 = vector.multi_reduction <add>, %25, %cst_14 [1] : vector<16x128xf32> to vector<16xf32>
      %27 = vector.shape_cast %26 : vector<16xf32> to vector<16x1xf32>
      %28 = arith.addf %22, %27 : vector<16x1xf32>
      %c0_15 = arith.constant 0 : index
      %c0_16 = arith.constant 0 : index
      %29 = vector.load %arg8[%c0_15, %c0_16] : memref<16x1xf32, #tpu.memory_space<vmem>>, vector<16x1xf32>
      tpu.vector_store %arg8[%c0_15, %c0_16], %28 {strides = array<i32>} : memref<16x1xf32, #tpu.memory_space<vmem>>, vector<16x1xf32>,
      %c0_17 = arith.constant 0 : index
      %c0_18 = arith.constant 0 : index
      %30 = vector.load %arg7[%c0_17, %c0_18] : memref<16x1xf32, #tpu.memory_space<vmem>>, vector<16x1xf32>
      tpu.vector_store %arg7[%c0_17, %c0_18], %18 {strides = array<i32>} : memref<16x1xf32, #tpu.memory_space<vmem>>, vector<16x1xf32>,
    } else {
    }
    %c1_i32 = arith.constant 1 : i32
    %9 = arith.cmpi eq, %arg1, %c1_i32 : i32
    %10 = arith.extui %9 : i1 to i32
    %c0_i32_6 = arith.constant 0 : i32
    %11 = arith.cmpi ne, %10, %c0_i32_6 : i32
    scf.if %11 {
      %c0_7 = arith.constant 0 : index
      %c0_8 = arith.constant 0 : index
      %12 = vector.load %arg7[%c0_7, %c0_8] : memref<16x1xf32, #tpu.memory_space<vmem>>, vector<16x1xf32>
      %c0_9 = arith.constant 0 : index
      %c0_10 = arith.constant 0 : index
      %13 = vector.load %arg8[%c0_9, %c0_10] : memref<16x1xf32, #tpu.memory_space<vmem>>, vector<16x1xf32>
      %14 = math.log %13 : vector<16x1xf32>
      %15 = arith.addf %12, %14 : vector<16x1xf32>
      %16 = vector.broadcast %15 : vector<16x1xf32> to vector<16x128xf32>
      %17 = arith.subf %5, %16 : vector<16x128xf32>
      %c0_11 = arith.constant 0 : index
      %c0_12 = arith.constant 0 : index
      %18 = vector.load %arg6[%c0_11, %c0_12] : memref<16x128xf32, #tpu.memory_space<vmem>>, vector<16x128xf32>
      tpu.vector_store %arg6[%c0_11, %c0_12], %17 {strides = array<i32>} : memref<16x128xf32, #tpu.memory_space<vmem>>, vector<16x128xf32>,
    } else {
    }
    return
  }
  func.func @transform_0(%arg0: i32, %arg1: i32, %arg2: i32) -> (i32, i32) {
    %c0_i32 = arith.constant 0 : i32
    %c0_i32_0 = arith.constant 0 : i32
    return %arg0, %c0_i32 : i32, i32
  }
  func.func @transform_1(%arg0: i32, %arg1: i32, %arg2: i32) -> (i32, i32) {
    %c0_i32 = arith.constant 0 : i32
    %c0_i32_0 = arith.constant 0 : i32
    return %c0_i32, %arg2 : i32, i32
  }
  func.func @transform_2(%arg0: i32, %arg1: i32, %arg2: i32) -> (i32, i32) {
    %c0_i32 = arith.constant 0 : i32
    %c0_i32_0 = arith.constant 0 : i32
    return %c0_i32, %arg2 : i32, i32
  }
  func.func @transform_3(%arg0: i32, %arg1: i32, %arg2: i32) -> (i32, i32) {
    %0 = arith.muli %arg1, %arg2 : i32
    %c0_i32 = arith.constant 0 : i32
    return %arg0, %0 : i32, i32
  }
}

</mosaic_0001>

<bundles_post_ra>
// kernel: tpu_custom_call.1
= control target key start
LH: loop header
LB: loop body
LE: loop exit
PB: predicated region body
PF: predicated region fallthrough
CT: control target
= control target key end

     0   :  { %8 = vsyncpa [#allocation5], 0  ;;  %s848_s0 = inlined_call_operand.hbm [shape: bf16[16,32], index: 0, kind: input, shape index: {}]   ;;  %s849_s1 = inlined_call_operand.hbm [shape: bf16[32,128], index: 1, kind: input, shape index: {}]   ;;  %s850_s2 = inlined_call_operand.vmem [shape: f32[1,128], index: 2, kind: input, shape index: {}]   ;;  %s851_s3 = inlined_call_operand.hbm [shape: f32[16,128], index: 3, kind: output, shape index: {}]  }
   0x1   :  { %9 = vsyncpa [#allocation8], 0 }
   0x2   :  { %10 = vsyncpa [#allocation6], 0 }
   0x3   :  { %12 = vsyncpa [#allocation6 + $0x1], 0  ;;  %s756_s12 = smov 0   ;;  %s758_s13 = smov 0  }
   0x4   :  { %s760_s14 = smov 0  }
   0x5 LB: > { %s489_s15 = sadd.s32 4294967295, %s723_s14   ;;  %s490_s16 = sadd.s32 4294967294, %s723_s14   ;;  %s723_s14 = sphi %s760_s14, %s18_s14   ;;  %s719_s13 = sphi %s758_s13, %s855_s13   ;;  %s715_s12 = sphi %s756_s12, %s854_s12  }
   0x6   : > { %s33_s17 = sadd.s32 1, %s719_s13  ;;  %p491_p0 = scmp.ge.s32.totalorder %s723_s14, 1 }
   0x7   : > { %p35_p1 = scmp.ge.s32.totalorder %s33_s17, 2  ;;  %p150_p2 = scmp.lt.s32.totalorder %s723_s14, 3 }
   0x8   : > { %p778_p3 = scmp.eq.s32.totalorder %s489_s15, 0  ;;  %s164_s22 = sshll.u32 %s848_s0, 4  ;;  %s165_s22 = int_to_ptr.hbm [resolvable:$true] %s164_s22 }
   0x9   : > { %s857_s17 = smov (%p35_p1, %s33_s17), 0  ;;  %p784_p4 = pnand %p491_p0, %p150_p2 }
   0xa   : > { %s725_s23 = smov [#allocation4]   ;;  %s180_s27 = sshll.u32 %s849_s1, 4  ;;  %s181_s27 = int_to_ptr.hbm [resolvable:$true] %s180_s27 }
   0xb   : > { %p532_p5 = pneg %p784_p4  ;;  %s166_s24 = sshll.u32 %s725_s23, 4  ;;  %s167_s24 = int_to_ptr.vmem [resolvable:$true] %s166_s24 }
   0xc   : > { %s726_s28 = smov 64   ;;  %s727_s29 = smov 4  }
   0xd   : > { %p533_p6 = pnand %p778_p3, %p532_p5  ;;  %s728_s30 = smov [#allocation7]  }
   0xe   : > { %s182_s4 = sshll.u32 %s728_s30, 4  ;;  %204 = sbr.rel (%p784_p4) target bundleno = 685 (0x2ad), region = 32  ;;  %s183_s4 = int_to_ptr.vmem [resolvable:$true] %s182_s4 }
   0xf   : > { %535 = dma.hbm_to_vmem [thread:$0]  (!%p533_p6), %s165_s22, 128, %s167_s24, [#allocation5], %s726_s28, %s726_s28, %s727_s29  }
  0x10   : > { %538 = dma.hbm_to_vmem [thread:$0]  (!%p533_p6), %s181_s27, 256, %s183_s4, [#allocation8], %s726_s28, %s726_s28, %s727_s29  }
  0x13   : > { %702 = dma.done.wait (%p778_p3), [#allocation5], 128  }
  0x14   : > { %704 = vsyncadd (%p778_p3), [#allocation5], 4294967168 }
  0x15   : > { %706 = dma.done.wait (%p778_p3), [#allocation8], 256  }
  0x16   : > { %708 = vsyncadd (%p778_p3), [#allocation8], 4294967040  ;;  %v519_v0 = vld [vmem:[#allocation7 + $0x8] sm:$0xff]  ;;  %v518_v1 = vld [vmem:[#allocation7] sm:$0xff]  ;;  %vm266_vm0 = vcmask 261120   ;;  %p511_p7 = scmp.ne.s32.totalorder %s715_s12, 0 }
  0x17   : > { %276 = vmatpush.bf16.msra.mxu0 %v519_v0  ;;  %v517_v2 = vld [vmem:[#allocation4] sm:$0xff] }
  0x18   : > { %v585_v3 = vld [vmem:[%s850_s2] ss:$0 sm:$0xff] }
  0x1b   : > { %277 = vmatpush.bf16.msra.mxu0 %v518_v1 }
  0x1e   : > { %510 = vmatmul.msk.bf16.vlgmr.msra.gmra.mxu0 %vm266_vm0, %v517_v2 }
  0x9b   : > { %v279_v4 = vpop.f32.mrf.mxu0 }
  0x9c   : > { %v811_v5 = vadd.f32 %v585_v3, %v279_v4 }
  0xa0   : > { %287 = sbr.rel (%p511_p7) target bundleno = 536 (0x218), region = 44 }
  0xa3   : > { %v281_v6 = vpop.f32.mrf.mxu0 }
  0xa4   : > { %v813_v7 = vadd.f32 %v585_v3, %v281_v6 }
  0xa5   : > { %299 = vmax.xlane.f32.xlu0 %v811_v5  ;;  %vm292_vm1 = vcmask 7168   ;;  %v729_v8 = vmov -inf   ;;  %v730_v9 = vmov 0   ;;  %v731_v10 = vmov 0.0  }
  0xa6   : > { %293 = vst.msk [vmem:[#allocation2] sm:$0xff] %vm292_vm1, %v729_v8  ;;  %586 = vset.pattern.permute.xlu1 %v730_v9  ;;  %587 = vset.pattern.permute.xlu0 %v730_v9 }
  0xa7   : > { %294 = vst.msk [vmem:[#allocation2 + $0x8] sm:$0xff] %vm292_vm1, %v729_v8 }
  0xa8   : > { %295 = vst.msk [vmem:[#allocation3] sm:$0xff] %vm292_vm1, %v731_v10 }
  0xa9   : > { %296 = vst.msk [vmem:[#allocation3 + $0x8] sm:$0xff] %vm292_vm1, %v731_v10 }
  0xad   : > { %301 = vmax.xlane.f32.xlu0 %v813_v7  ;;  %v297_v11 = vld [vmem:[#allocation2] sm:$0xff] }
  0xae   : > { %v298_v15 = vld [vmem:[#allocation2 + $0x8] sm:$0xff] }
  0xaf   : > { %v305_v30 = vld [vmem:[#allocation3] sm:$0xff] }
  0xb0   : > { %v306_v35 = vld [vmem:[#allocation3 + $0x8] sm:$0xff] }
 0x118   : > { %v300_v12 = vpop.xlane.xlu0 %299 }
 0x119   : > { %v303_v13 = vmax.f32 %v297_v11, %v300_v12 }
 0x11b   : > { %v307_v14 = vsub.f32 %v297_v11, %v303_v13  ;;  %340 = vst.msk [vmem:[#allocation2] sm:$0xff] %vm292_vm1, %v303_v13  ;;  %317 = vperm.xlu1 %586, %v303_v13  }
 0x11d   : > { %v309_v27 = vmul.f32 1.442695, %v307_v14 }
 0x120   : > { %v302_v16 = vpop.xlane.xlu0 %301 }
 0x121   : > { %v304_v17 = vmax.f32 %v298_v15, %v302_v16 }
 0x123   : > { %v308_v18 = vsub.f32 %v298_v15, %v304_v17  ;;  %341 = vst.msk [vmem:[#allocation2 + $0x8] sm:$0xff] %vm292_vm1, %v304_v17  ;;  %322 = vperm.xlu1 %586, %v304_v17  }
 0x125   : > { %v311_v28 = vmul.f32 1.442695, %v308_v18 }
 0x18d   : > { %v318_v19 = vpop.permute.xlu1 %317 }
 0x18e   : > { %v325_v20 = vsub.f32 %v811_v5, %v318_v19 }
 0x190   : > { %v327_v21 = vmul.f32 1.442695, %v325_v20 }
 0x192   : > { %588 = vpow2.f32 %v327_v21 }
 0x195   : > { %v323_v22 = vpop.permute.xlu1 %322 }
 0x196   : > { %v326_v23 = vsub.f32 %v813_v7, %v323_v22 }
 0x198   : > { %v589_v24 = vpop.eup %588  ;;  %v329_v25 = vmul.f32 1.442695, %v326_v23 }
 0x199   : > { %331 = vadd.xlane.f32.xlu2 %v589_v24 }
 0x19a   : > { %590 = vpow2.f32 %v329_v25 }
 0x19b   : > { %592 = vpow2.f32 %v309_v27 }
 0x19c   : > { %594 = vpow2.f32 %v311_v28 }
 0x1a0   : > { %v591_v26 = vpop.eup %590 }
 0x1a1   : > { %333 = vadd.xlane.f32.xlu2 %v591_v26  ;;  %v593_v29 = vpop.eup %592 }
 0x1a2   : > { %v313_v31 = vmul.f32 %v593_v29, %v305_v30  ;;  %v595_v34 = vpop.eup %594 }
 0x1a3   : > { %v314_v36 = vmul.f32 %v595_v34, %v306_v35 }
 0x20c   : > { %v332_v32 = vpop.xlane.xlu2 %331 }
 0x20d   : > { %v335_v33 = vadd.f32 %v332_v32, %v313_v31 }
 0x20f   : > { %338 = vst.msk [vmem:[#allocation3] sm:$0xff] %vm292_vm1, %v335_v33 }
 0x214   : > { %v334_v37 = vpop.xlane.xlu2 %333 }
 0x215   : > { %v336_v38 = vadd.f32 %v334_v37, %v314_v36 }
 0x217   : > { %339 = vst.msk [vmem:[#allocation3 + $0x8] sm:$0xff] %vm292_vm1, %v336_v38 }
 0x218 PF: > { %p512_p8 = scmp.ne.s32.totalorder %s715_s12, 1 }
 0x21a   : > { %345 = sbr.rel (%p512_p8) target bundleno = 681 (0x2a9), region = 52 }
 0x21f   : > { %v348_v39 = vld [vmem:[#allocation3] sm:$0xff]  ;;  %v732_v40 = vmov 0   ;;  %v349_v41 = vld [vmem:[#allocation3 + $0x8] sm:$0xff]  ;;  %v346_v43 = vld [vmem:[#allocation2] sm:$0xff] }
 0x220   : > { %596 = vset.pattern.permute.xlu0 %v732_v40  ;;  %597 = vlog2.f32 %v348_v39  ;;  %v347_v48 = vld [vmem:[#allocation2 + $0x8] sm:$0xff] }
 0x221   : > { %599 = vlog2.f32 %v349_v41 }
 0x226   : > { %v598_v42 = vpop.eup %597 }
 0x227   : > { %v351_v44 = vmul.f32 0.6931472, %v598_v42  ;;  %v600_v45 = vpop.eup %599 }
 0x228   : > { %v353_v47 = vmul.f32 0.6931472, %v600_v45 }
 0x229   : > { %v354_v46 = vadd.f32 %v351_v44, %v346_v43 }
 0x22a   : > { %v355_v49 = vadd.f32 %v353_v47, %v347_v48 }
 0x22b   : > { %358 = vperm.xlu0 %596, %v354_v46  }
 0x233   : > { %363 = vperm.xlu0 %596, %v355_v49  }
 0x29d   : > { %v359_v50 = vpop.permute.xlu0 %358 }
 0x29e   : > { %v366_v51 = vsub.f32 %v811_v5, %v359_v50 }
 0x2a0   : > { %368 = vst [vmem:[#allocation9] sm:$0xff] %v366_v51 }
 0x2a5   : > { %v364_v52 = vpop.permute.xlu0 %363 }
 0x2a6   : > { %v367_v53 = vsub.f32 %v813_v7, %v364_v52 }
 0x2a8   : > { %369 = vst [vmem:[#allocation9 + $0x8] sm:$0xff] %v367_v53 }
 0x2a9 PF: > { %p547_p9 = scmp.eq.s32.totalorder %s489_s15, 1  ;;  %s387_s9 = sshll.u32 %s851_s3, 4  ;;  %s388_s9 = int_to_ptr.hbm [resolvable:$true] %s387_s9 }
 0x2aa   : > { %s733_s10 = smov [#allocation9]   ;;  %s734_s12 = smov 128  }
 0x2ab   : > { %s385_s11 = sshll.u32 %s733_s10, 4  ;;  %s735_s18 = smov 8   ;;  %s386_s11 = int_to_ptr.vmem [resolvable:$true] %s385_s11 }
 0x2ac   : > { %529 = dma.vmem_to_hbm [thread:$0]  (%p547_p9), %s386_s11, 256, %s388_s9, [#allocation6], %s734_s12, %s734_s12, %s735_s18  }
 0x2ad PF: > { %p548_p10 = scmp.ge.s32.totalorder %s723_s14, 2  ;;  %p549_p11 = scmp.eq.s32.totalorder %s490_s16, 1 }
 0x2af   : > { %p540_p12 = pnand %p549_p11, %p548_p10 }
 0x2b1   : > { %p541_p13 = pneg %p540_p12 }
 0x2b3   : > { %710 = dma.done.wait (%p541_p13), [#allocation6], 256  }
 0x2b4   : > { %712 = vsyncadd (%p541_p13), [#allocation6], 4294967040  ;;  %s18_s14 = sadd.s32 1, %s723_s14   ;;  %s854_s12 = smov %s719_s13 }
 0x2b5   : > { %p15_p0 = scmp.ge.s32.totalorder %s18_s14, 4   ;;  %s855_s13 = smov %s857_s17 }
 0x2b7   :  { %17 = sbr.rel (!%p15_p0) target bundleno = 5 (0x5), region = 90 }
 0x2bc   :  { %409 = vsyncpa [#allocation5], 1 }
 0x2bd   :  { %411 = vsyncpa [#allocation5 + $0x1], 1 }
 0x2be   :  { %412 = vsyncpa [#allocation8], 1 }
 0x2bf   :  { %413 = vsyncpa [#allocation6], 1 }
 0x2c0   :  { %415 = vsyncpa [#allocation6 + $0x1], 1 }

</bundles_post_ra>
